<compile_context>
chip_gen: v7x
topology: tpu7x:2x2x1
jax: 0.10.0
libtpu: 0.0.40
codegen_flags: <defaults>
</compile_context>

<pallas_src>
import functools

import jax
import jax.numpy as jnp
from jax.experimental import pallas as pl
from jax.experimental.pallas import tpu as pltpu

STATE_DIM = 6
ACTION_DIM = 8
HIDDEN_DIM = 64

IN_PAD = 8               # state features padded 6 -> 8 (once for w1, per call for x)
_MIN_SPLIT_ROWS = 1024   # only split a single-tile batch for megacore if halves stay >= this


def _round_up(n, m):
    return ((n + m - 1) // m) * m


def dqn_kernel(x_ref, w1_ref, b1_ref, w2_ref, b2_ref, w3_ref, b3_ref, o_ref):
    """One batch tile of the 3-layer MLP. Weights are (in, out); biases are (1, out) f32."""
    cdt = w1_ref.dtype  # matmul operand dtype (f32 or bf16); accumulation is always f32.

    # layer1 + ReLU : (TB, IN_PAD) @ (IN_PAD, H)
    x = x_ref[...].astype(cdt)
    h1 = jnp.dot(x, w1_ref[...], preferred_element_type=jnp.float32) + b1_ref[...]
    h1 = jnp.maximum(h1, 0.0)

    # layer2 + ReLU : (TB, H) @ (H, H)
    h2 = jnp.dot(h1.astype(cdt), w2_ref[...], preferred_element_type=jnp.float32) + b2_ref[...]
    h2 = jnp.maximum(h2, 0.0)

    # layer3 (no activation), logical-width output : (TB, H) @ (H, ACTION_DIM)
    out = jnp.dot(h2.astype(cdt), w3_ref[...], preferred_element_type=jnp.float32) + b3_ref[...]
    o_ref[...] = out.astype(o_ref.dtype)


def init_linear_params(key, in_features, out_features):
    """PyTorch nn.Linear default init: U(-1/sqrt(in), 1/sqrt(in)) for W and b.
    Weight is returned pre-transposed as (in_features, out_features)."""
    kw, kb = jax.random.split(key)
    bound = 1.0 / jnp.sqrt(jnp.float32(in_features))
    w = jax.random.uniform(kw, (in_features, out_features), jnp.float32, -bound, bound)
    b = jax.random.uniform(kb, (1, out_features), jnp.float32, -bound, bound)
    return w, b


def prepare_params(params, compute_dtype=jnp.float32):
    """One-time parameter prep (hoisted out of the forward path):
    - zero-pad w1's feature rows 6 -> 8 (mathematically inert),
    - cast weights to the matmul operand dtype (f32 or bf16 for v6e/v7x),
    - keep biases f32 (bias-add / ReLU run in f32 on all generations)."""
    w1, b1, w2, b2, w3, b3 = params
    w1_p = jnp.pad(w1, ((0, IN_PAD - w1.shape[0]), (0, 0)))
    cd = compute_dtype
    return (w1_p.astype(cd), b1.astype(jnp.float32),
            w2.astype(cd), b2.astype(jnp.float32),
            w3.astype(cd), b3.astype(jnp.float32))


def _choose_tb(batch, tb_max):
    tb_max = max(8, _round_up(tb_max, 8))     # keep (8,128) divisibility for the batch axis
    b8 = _round_up(batch, 8)
    tb = min(tb_max, b8)
    # v7x has 2 TensorCores: ensure the "parallel" grid has >= 2 steps when the batch
    # is large enough that each half-tile still amortizes per-step overhead.
    if tb == b8 and b8 >= 2 * _MIN_SPLIT_ROWS:
        tb = _round_up((b8 + 1) // 2, 8)
    return tb


@functools.partial(jax.jit, static_argnames=("tb_max",))
def dqn_forward(x, prepared_params, *, tb_max=4096):
    """x: (B, STATE_DIM) f32. prepared_params: output of prepare_params()."""
    w1, b1, w2, b2, w3, b3 = prepared_params
    B, state_dim = x.shape
    assert state_dim == STATE_DIM

    TB = _choose_tb(B, tb_max)
    B_pad = _round_up(B, TB)

    # Only per-call prep: pad batch rows to a tile multiple and features 6 -> 8.
    x_p = x
    if B_pad != B or state_dim != IN_PAD:
        x_p = jnp.pad(x, ((0, B_pad - B), (0, IN_PAD - state_dim)))

    grid = (B_pad // TB,)

    def const_spec(arr):
        # Whole array as one block, same block every grid step -> DMA'd once, VMEM-resident.
        return pl.BlockSpec(arr.shape, lambda i: (0,) * arr.ndim)

    out = pl.pallas_call(
        dqn_kernel,
        out_shape=jax.ShapeDtypeStruct((B_pad, ACTION_DIM), jnp.float32),
        grid=grid,
        in_specs=[
            pl.BlockSpec((TB, IN_PAD), lambda i: (i, 0)),   # x: tiled over batch
            const_spec(w1), const_spec(b1),
            const_spec(w2), const_spec(b2),
            const_spec(w3), const_spec(b3),
        ],
        # Narrow output block: last dim (8) equals the full array dim, so only the
        # logical bytes are written to HBM and no wrapper slab-slice pass is needed.
        out_specs=pl.BlockSpec((TB, ACTION_DIM), lambda i: (i, 0)),
        compiler_params=pltpu.CompilerParams(
            dimension_semantics=("parallel",),
        ),
    )(x_p, w1, b1, w2, b2, w3, b3)

    return out[:B] if B_pad != B else out


def reference_forward(x, params, compute_dtype=jnp.float32):
    """Pure-JAX reference matching the kernel's math (operand cast, f32 accumulate)."""
    w1, b1, w2, b2, w3, b3 = params
    cd = compute_dtype
    h1 = jnp.maximum(
        jnp.dot(x.astype(cd), w1.astype(cd), preferred_element_type=jnp.float32) + b1, 0.0)
    h2 = jnp.maximum(
        jnp.dot(h1.astype(cd), w2.astype(cd), preferred_element_type=jnp.float32) + b2, 0.0)
    return jnp.dot(h2.astype(cd), w3.astype(cd), preferred_element_type=jnp.float32) + b3


if __name__ == "__main__":
    key = jax.random.PRNGKey(0)
    k_x, k1, k2, k3 = jax.random.split(key, 4)

    w1, b1 = init_linear_params(k1, STATE_DIM, HIDDEN_DIM)
    w2, b2 = init_linear_params(k2, HIDDEN_DIM, HIDDEN_DIM)
    w3, b3 = init_linear_params(k3, HIDDEN_DIM, ACTION_DIM)
    raw_params = (w1, b1, w2, b2, w3, b3)

    params_f32 = prepare_params(raw_params, jnp.float32)
    params_bf16 = prepare_params(raw_params, jnp.bfloat16)   # v6e/v7x matmul-operand path

    # Small single-tile case.
    batch = 8
    x = jax.random.normal(k_x, (batch, STATE_DIM), jnp.float32)
    out = dqn_forward(x, params_f32)
    jax.block_until_ready(out)
    ref = reference_forward(x, raw_params)
    assert out.shape == (batch, ACTION_DIM), out.shape
    assert jnp.allclose(out, ref, atol=1e-5, rtol=1e-5), "f32 mismatch vs reference (B=8)"

    # Non-multiple batch -> row padding + multi-step grid.
    batch2 = 100
    x2 = jax.random.normal(k_x, (batch2, STATE_DIM), jnp.float32)
    out2 = dqn_forward(x2, params_f32, tb_max=64)
    jax.block_until_ready(out2)
    ref2 = reference_forward(x2, raw_params)
    assert out2.shape == (batch2, ACTION_DIM), out2.shape
    assert jnp.allclose(out2, ref2, atol=1e-5, rtol=1e-5), "f32 mismatch vs reference (B=100)"

    # bf16 matmul-operand path (f32 accumulation, f32 bias/ReLU) vs matching reference.
    out3 = dqn_forward(x2, params_bf16, tb_max=64)
    jax.block_until_ready(out3)
    ref3 = reference_forward(x2, raw_params, compute_dtype=jnp.bfloat16)
    assert out3.shape == (batch2, ACTION_DIM), out3.shape
    assert jnp.allclose(out3, ref3, atol=2e-2, rtol=2e-2), "bf16 mismatch vs reference (B=100)"

    print("KERNEL_OK")
</pallas_src>

<mosaic_0001>
module attributes {stable_mosaic.version = 11 : i64} {
  func.func @dqn_kernel(%arg0: i32, %arg1: memref<8x8xf32, #tpu.memory_space<vmem>>, %arg2: memref<8x64xf32, #tpu.memory_space<vmem>>, %arg3: memref<1x64xf32, #tpu.memory_space<vmem>>, %arg4: memref<64x64xf32, #tpu.memory_space<vmem>>, %arg5: memref<1x64xf32, #tpu.memory_space<vmem>>, %arg6: memref<64x8xf32, #tpu.memory_space<vmem>>, %arg7: memref<1x8xf32, #tpu.memory_space<vmem>>, %arg8: memref<8x8xf32, #tpu.memory_space<vmem>>) attributes {dimension_semantics = [#tpu.dimension_semantics<parallel>], iteration_bounds = array<i64: 1>, scalar_prefetch = 0 : i64, scratch_operands = 0 : i64, tpu.core_type = #tpu.core_type<tc>, window_params = [{transform_indices = @transform_0, window_bounds = array<i64: 8, 8>}, {pipeline_mode = #tpu.pipeline_mode<synchronous>, transform_indices = @transform_1, window_bounds = array<i64: 8, 64>}, {pipeline_mode = #tpu.pipeline_mode<synchronous>, transform_indices = @transform_2, window_bounds = array<i64: 1, 64>}, {pipeline_mode = #tpu.pipeline_mode<synchronous>, transform_indices = @transform_3, window_bounds = array<i64: 64, 64>}, {pipeline_mode = #tpu.pipeline_mode<synchronous>, transform_indices = @transform_4, window_bounds = array<i64: 1, 64>}, {pipeline_mode = #tpu.pipeline_mode<synchronous>, transform_indices = @transform_5, window_bounds = array<i64: 64, 8>}, {pipeline_mode = #tpu.pipeline_mode<synchronous>, transform_indices = @transform_6, window_bounds = array<i64: 1, 8>}, {transform_indices = @transform_7, window_bounds = array<i64: 8, 8>}]} {
    %c0 = arith.constant 0 : index
    %c0_0 = arith.constant 0 : index
    %0 = vector.load %arg1[%c0, %c0_0] : memref<8x8xf32, #tpu.memory_space<vmem>>, vector<8x8xf32>
    %c0_1 = arith.constant 0 : index
    %c0_2 = arith.constant 0 : index
    %1 = vector.load %arg2[%c0_1, %c0_2] : memref<8x64xf32, #tpu.memory_space<vmem>>, vector<8x64xf32>
    %cst = arith.constant dense<0.000000e+00> : vector<8x64xf32>
    %2 = tpu.matmul %0, %1, %cst {dimension_numbers = #tpu.dot_dimension_numbers<[1], [0], [0], [1], [0, 0, 1, 1], [], []>} : vector<8x8xf32>, vector<8x64xf32>, vector<8x64xf32> -> vector<8x64xf32>
    %c0_3 = arith.constant 0 : index
    %c0_4 = arith.constant 0 : index
    %3 = vector.load %arg3[%c0_3, %c0_4] : memref<1x64xf32, #tpu.memory_space<vmem>>, vector<1x64xf32>
    %4 = vector.broadcast %3 : vector<1x64xf32> to vector<8x64xf32>
    %5 = arith.addf %2, %4 : vector<8x64xf32>
    %cst_5 = arith.constant 0.000000e+00 : f32
    %6 = vector.broadcast %cst_5 : f32 to vector<8x64xf32>
    %7 = arith.maximumf %5, %6 : vector<8x64xf32>
    %c0_6 = arith.constant 0 : index
    %c0_7 = arith.constant 0 : index
    %8 = vector.load %arg4[%c0_6, %c0_7] : memref<64x64xf32, #tpu.memory_space<vmem>>, vector<64x64xf32>
    %cst_8 = arith.constant dense<0.000000e+00> : vector<8x64xf32>
    %9 = tpu.matmul %7, %8, %cst_8 {dimension_numbers = #tpu.dot_dimension_numbers<[1], [0], [0], [1], [0, 0, 1, 1], [], []>} : vector<8x64xf32>, vector<64x64xf32>, vector<8x64xf32> -> vector<8x64xf32>
    %c0_9 = arith.constant 0 : index
    %c0_10 = arith.constant 0 : index
    %10 = vector.load %arg5[%c0_9, %c0_10] : memref<1x64xf32, #tpu.memory_space<vmem>>, vector<1x64xf32>
    %11 = vector.broadcast %10 : vector<1x64xf32> to vector<8x64xf32>
    %12 = arith.addf %9, %11 : vector<8x64xf32>
    %cst_11 = arith.constant 0.000000e+00 : f32
    %13 = vector.broadcast %cst_11 : f32 to vector<8x64xf32>
    %14 = arith.maximumf %12, %13 : vector<8x64xf32>
    %c0_12 = arith.constant 0 : index
    %c0_13 = arith.constant 0 : index
    %15 = vector.load %arg6[%c0_12, %c0_13] : memref<64x8xf32, #tpu.memory_space<vmem>>, vector<64x8xf32>
    %cst_14 = arith.constant dense<0.000000e+00> : vector<8x8xf32>
    %16 = tpu.matmul %14, %15, %cst_14 {dimension_numbers = #tpu.dot_dimension_numbers<[1], [0], [0], [1], [0, 0, 1, 1], [], []>} : vector<8x64xf32>, vector<64x8xf32>, vector<8x8xf32> -> vector<8x8xf32>
    %c0_15 = arith.constant 0 : index
    %c0_16 = arith.constant 0 : index
    %17 = vector.load %arg7[%c0_15, %c0_16] : memref<1x8xf32, #tpu.memory_space<vmem>>, vector<1x8xf32>
    %18 = vector.broadcast %17 : vector<1x8xf32> to vector<8x8xf32>
    %19 = arith.addf %16, %18 : vector<8x8xf32>
    %c0_17 = arith.constant 0 : index
    %c0_18 = arith.constant 0 : index
    %20 = vector.load %arg8[%c0_17, %c0_18] : memref<8x8xf32, #tpu.memory_space<vmem>>, vector<8x8xf32>
    tpu.vector_store %arg8[%c0_17, %c0_18], %19 {strides = array<i32>} : memref<8x8xf32, #tpu.memory_space<vmem>>, vector<8x8xf32>,
    return
  }
  func.func @transform_0(%arg0: i32) -> (i32, i32) {
    %c0_i32 = arith.constant 0 : i32
    %c0_i32_0 = arith.constant 0 : i32
    return %arg0, %c0_i32 : i32, i32
  }
  func.func @transform_1(%arg0: i32) -> (i32, i32) {
    %c0_i32 = arith.constant 0 : i32
    %c0_i32_0 = arith.constant 0 : i32
    %c0_i32_1 = arith.constant 0 : i32
    return %c0_i32, %c0_i32_0 : i32, i32
  }
  func.func @transform_2(%arg0: i32) -> (i32, i32) {
    %c0_i32 = arith.constant 0 : i32
    %c0_i32_0 = arith.constant 0 : i32
    %c0_i32_1 = arith.constant 0 : i32
    return %c0_i32, %c0_i32_0 : i32, i32
  }
  func.func @transform_3(%arg0: i32) -> (i32, i32) {
    %c0_i32 = arith.constant 0 : i32
    %c0_i32_0 = arith.constant 0 : i32
    %c0_i32_1 = arith.constant 0 : i32
    return %c0_i32, %c0_i32_0 : i32, i32
  }
  func.func @transform_4(%arg0: i32) -> (i32, i32) {
    %c0_i32 = arith.constant 0 : i32
    %c0_i32_0 = arith.constant 0 : i32
    %c0_i32_1 = arith.constant 0 : i32
    return %c0_i32, %c0_i32_0 : i32, i32
  }
  func.func @transform_5(%arg0: i32) -> (i32, i32) {
    %c0_i32 = arith.constant 0 : i32
    %c0_i32_0 = arith.constant 0 : i32
    %c0_i32_1 = arith.constant 0 : i32
    return %c0_i32, %c0_i32_0 : i32, i32
  }
  func.func @transform_6(%arg0: i32) -> (i32, i32) {
    %c0_i32 = arith.constant 0 : i32
    %c0_i32_0 = arith.constant 0 : i32
    %c0_i32_1 = arith.constant 0 : i32
    return %c0_i32, %c0_i32_0 : i32, i32
  }
  func.func @transform_7(%arg0: i32) -> (i32, i32) {
    %c0_i32 = arith.constant 0 : i32
    %c0_i32_0 = arith.constant 0 : i32
    return %arg0, %c0_i32 : i32, i32
  }
}

</mosaic_0001>

<bundles_post_ra>
// kernel: dqn_forward.1
= control target key start
LH: loop header
LB: loop body
LE: loop exit
PB: predicated region body
PF: predicated region fallthrough
CT: control target
= control target key end

     0   :  { %vm36_vm0 = vcmask 64512   ;;  %v425_v2 = vmov 0.0   ;;  %vm426_vm1 = vmmov 0   ;;  %v427_v6 = vmov 0.0|0.0   ;;  %s549_s0 = inlined_call_operand.vmem [shape: f32[8,8], index: 0, kind: input, shape index: {}]   ;;  %s550_s1 = inlined_call_operand.vmem [shape: f32[8,64], index: 1, kind: input, shape index: {}]   ;;  %s551_s2 = inlined_call_operand.vmem [shape: f32[1,64], index: 2, kind: input, shape index: {}]   ;;  %s552_s3 = inlined_call_operand.vmem [shape: f32[64,64], index: 3, kind: input, shape index: {}]   ;;  %s553_s4 = inlined_call_operand.vmem [shape: f32[1,64], index: 4, kind: input, shape index: {}]   ;;  %s554_s5 = inlined_call_operand.vmem [shape: f32[64,8], index: 5, kind: input, shape index: {}]   ;;  %s555_s6 = inlined_call_operand.vmem [shape: f32[1,8], index: 6, kind: input, shape index: {}]   ;;  %s556_s7 = inlined_call_operand.hbm [shape: f32[8,8], index: 7, kind: output, shape index: {}]  }
   0x1   :  { %v28_v0 = vld [vmem:[%s550_s1] sm:$0xff]  ;;  %330 = vmatprep.subr.mxu0 %v425_v2  ;;  %332 = vmatprep.mubr.msk.f32.mxu0 %vm426_vm1, %v425_v2  ;;  %v112_v4 = vld [vmem:[%s552_s3 + $0x8] sm:$0xff]  ;;  %v113_v5 = vld [vmem:[%s552_s3 + $0x10] sm:$0xff] }
   0x2   :  { %v27_v1 = vld [vmem:[%s549_s0] sm:$0xff]  ;;  %331 = vmatpush3.msra.mxu0 %v28_v0  ;;  %373 = vmatprep.subr.bf16.mxu1 %v427_v6  ;;  %v114_v8 = vld [vmem:[%s552_s3 + $0x18] sm:$0xff] }
   0x3   :  { %v111_v3 = vld [vmem:[%s552_s3] sm:$0xff]  ;;  %333 = vmatmul.mubr.msk.f32.vlgmr.msra.gmra.mrb[0].mxu0 %vm36_vm0, %v27_v1  ;;  %351 = vmatprep.mubr.msk.f32.mxu1 %vm426_vm1, %v425_v2 }
   0x4   :  { %v374_v7 = vpack.c.bf16 %v112_v4, %v111_v3 }
   0x5   :  { %12 = vsyncpa [#allocation3], 0  ;;  %v377_v9 = vpack.c.bf16 %v114_v8, %v113_v5  ;;  %385 = vmatprep.subr.bf16.mxu0 %v427_v6  ;;  %v115_v10 = vld [vmem:[%s552_s3 + $0x20] sm:$0xff]  ;;  %v116_v11 = vld [vmem:[%s552_s3 + $0x28] sm:$0xff]  ;;  %370 = vmatprep.mubr.msk.f32.mxu0 %vm426_vm1, %v425_v2  ;;  %vm126_vm2 = vcmask 523264   ;;  %s428_s14 = smov [#allocation2]  }
   0x6   :  { %375 = vmatpush3.bf16.msra.mxu1 %v374_v7  ;;  %v380_v12 = vpack.c.bf16 %v116_v11, %v115_v10  ;;  %v117_v13 = vld [vmem:[%s552_s3 + $0x30] sm:$0xff]  ;;  %v118_v14 = vld [vmem:[%s552_s3 + $0x38] sm:$0xff]  ;;  %v201_v16 = vld [vmem:[%s554_s5] sm:$0xff]  ;;  %s296_s15 = sshll.u32 %s428_s14, 4  ;;  %s297_s15 = int_to_ptr.vmem [resolvable:$true] %s296_s15 }
   0x7   :  { %376 = vmatprep.subr.bf16.mxu1 %v427_v6  ;;  %v383_v15 = vpack.c.bf16 %v118_v14, %v117_v13  ;;  %v202_v17 = vld [vmem:[%s554_s5 + $0x8] sm:$0xff]  ;;  %v203_v18 = vld [vmem:[%s554_s5 + $0x10] sm:$0xff]  ;;  %v204_v20 = vld [vmem:[%s554_s5 + $0x18] sm:$0xff]  ;;  %p406_p1 = scmp.lt.s32.totalorder %s297_s15, %s297_s15 }
   0x8   :  { %v386_v19 = vpack.c.bf16 %v202_v17, %v201_v16  ;;  %v389_v21 = vpack.c.bf16 %v204_v20, %v203_v18  ;;  %v205_v22 = vld [vmem:[%s554_s5 + $0x20] sm:$0xff]  ;;  %v206_v23 = vld [vmem:[%s554_s5 + $0x28] sm:$0xff]  ;;  %v207_v30 = vld [vmem:[%s554_s5 + $0x30] sm:$0xff] }
   0x9   :  { %v392_v24 = vpack.c.bf16 %v206_v23, %v205_v22  ;;  %v304_v25 = vld [vmem:[%s551_s2] ss:$0 sm:$0xff]  ;;  %v208_v31 = vld [vmem:[%s554_s5 + $0x38] sm:$0xff]  ;;  %s401_s5 = scalar_lea.vmem %s297_s15, 128 }
   0xa   :  { %378 = vmatpush3.bf16.msra.mxu1 %v377_v9  ;;  %387 = vmatpush3.bf16.msra.mxu0 %v386_v19  ;;  %v395_v32 = vpack.c.bf16 %v208_v31, %v207_v30  ;;  %v306_v33 = vld [vmem:[%s553_s4] ss:$0 sm:$0xff]  ;;  %p402_p0 = scmp.ne.s32.totalorder %s297_s15, %s401_s5  ;;  %p407_p2 = scmp.lt.s32.totalorder %s401_s5, %s401_s5 }
   0xb   :  { %379 = vmatprep.subr.bf16.mxu1 %v427_v6  ;;  %388 = vmatprep.subr.bf16.mxu0 %v427_v6  ;;  %v308_v38 = vld [vmem:[%s555_s6] ss:$0 sm:$0xff] }
   0xc   :  { %p408_p3 = por %p407_p2, %p406_p1 }
   0xe   :  { %381 = vmatpush3.bf16.msra.mxu1 %v380_v12  ;;  %390 = vmatpush3.bf16.msra.mxu0 %v389_v21  ;;  %p409_p4 = pnand %p408_p3, %p402_p0 }
   0xf   :  { %382 = vmatprep.subr.bf16.mxu1 %v427_v6  ;;  %391 = vmatprep.subr.bf16.mxu0 %v427_v6 }
  0x12   :  { %384 = vmatpush3.bf16.msra.mxu1 %v383_v15  ;;  %393 = vmatpush3.bf16.msra.mxu0 %v392_v24 }
  0x13   :  { %394 = vmatprep.subr.bf16.mxu0 %v427_v6 }
  0x16   :  { %396 = vmatpush3.bf16.msra.mxu0 %v395_v32 }
  0xd6   :  { %v106_v26 = vpop.f32.mrb[0].mxu0 }
  0xd7   :  { %v107_v27 = vadd.f32 %v304_v25, %v106_v26  ;;  %v334_v28 = vpop.f32.mrb[1].mxu0 }
  0xd9   :  { %v110_v29 = vmax.f32 %v107_v27, 0.0 }
  0xdb   :  { %352 = vmatmul.mubr.msk.f32.vlgmr.msra.gmra.mrb[0].mxu1 %vm126_vm2, %v110_v29 }
 0x1ae   :  { %v196_v34 = vpop.f32.mrb[0].mxu1 }
 0x1af   :  { %v197_v35 = vadd.f32 %v306_v33, %v196_v34  ;;  %v353_v36 = vpop.f32.mrb[1].mxu1 }
 0x1b1   :  { %v200_v37 = vmax.f32 %v197_v35, 0.0 }
 0x1b3   :  { %371 = vmatmul.mubr.msk.f32.vlgmr.msra.gmra.mrb[2].mxu0 %vm126_vm2, %v200_v37 }
 0x286   :  { %v285_v39 = vpop.f32.mrb[2].mxu0 }
 0x287   :  { %v286_v40 = vadd.f32 %v308_v38, %v285_v39  ;;  %v372_v41 = vpop.f32.mrb[3].mxu0 }
 0x289   :  { %289 = vst.msk [vmem:[#allocation2] sm:$0xff] %vm36_vm0, %v286_v40 }
 0x28a   :  { %412 = shalt.err (!%p409_p4)
}
 0x28b   :  { %s413_s17 = scalar_lea.hbm %s556_s7, 128 }
 0x28c   :  { %p414_p5 = scmp.ne.s32.totalorder %s556_s7, %s413_s17  ;;  %p417_p6 = scmp.lt.u32.totalorder %s413_s17, %s556_s7 }
 0x28e   :  { %p419_p7 = pnand %p417_p6, %p414_p5 }
 0x290   :  { %422 = shalt.err (!%p419_p7)
}
 0x291   :  { %299 = dma.vmem_to_hbm [thread:$0]  %s297_s15, 128, %s556_s7, [#allocation3]  }
 0x292   :  { %423 = dma.done.wait [#allocation3], 128  }
 0x293   :  { %424 = vsyncadd [#allocation3], 4294967168 }
 0x294   :  { %303 = vsyncpa [#allocation3], 1 }

</bundles_post_ra>
